<compile_context>
chip_gen: v6e
topology: v6e:2x2x1
jax: 0.10.0
libtpu: 0.0.40
codegen_flags: <defaults>
</compile_context>

<pallas_src>
import functools

import jax
import jax.numpy as jnp
from jax.experimental import pallas as pl
from jax.experimental.pallas import tpu as pltpu


def _cdiv(a, b):
    return (a + b - 1) // b


def _round_up(x, m):
    return ((x + m - 1) // m) * m


# ---------------------------------------------------------------------------
# Kernels
# ---------------------------------------------------------------------------

def mlp_resident_kernel(x_ref, w1_ref, b1_ref, w2_ref, b2_ref, o_ref):
    """Whole-weight-resident path.  Grid = (token_tiles,)."""
    h = jnp.dot(x_ref[...], w1_ref[...], preferred_element_type=jnp.float32)
    h = h + b1_ref[...].astype(jnp.float32)
    # Exact erf GELU (matches torch.nn.GELU() default numerics).
    h = 0.5 * h * (1.0 + jax.lax.erf(h * 0.7071067811865476))
    # dropout(p=0.0) -> identity.
    y = jnp.dot(h.astype(w2_ref.dtype), w2_ref[...],
                preferred_element_type=jnp.float32)
    o_ref[...] = (y + b2_ref[...].astype(jnp.float32)).astype(o_ref.dtype)


def mlp_tiled_kernel(x_ref, w1_ref, b1_ref, w2_ref, b2_ref, o_ref, acc_ref):
    """Hidden-axis reduction path.  Grid = (token_tiles, hidden_tiles)."""
    h_idx = pl.program_id(1)

    @pl.when(h_idx == 0)
    def _():
        # Fold b2 into the accumulator init (removes an epilogue VPU add on
        # the critical path right before the output store).
        acc_ref[...] = jnp.broadcast_to(
            b2_ref[...].astype(jnp.float32), acc_ref.shape)

    h = jnp.dot(x_ref[...], w1_ref[...], preferred_element_type=jnp.float32)
    h = h + b1_ref[...].astype(jnp.float32)
    h = 0.5 * h * (1.0 + jax.lax.erf(h * 0.7071067811865476))
    # dropout(p=0.0) -> identity.
    acc_ref[...] += jnp.dot(h.astype(w2_ref.dtype), w2_ref[...],
                            preferred_element_type=jnp.float32)

    @pl.when(h_idx == pl.num_programs(1) - 1)
    def _():
        o_ref[...] = acc_ref[...].astype(o_ref.dtype)


# ---------------------------------------------------------------------------
# Tiling / budgeting helpers (all trace-time Python ints)
# ---------------------------------------------------------------------------

def _vmem_budget_bytes():
    """Per-generation VMEM budget: ~100 MiB on 128-MiB chips (v5e/v6e),
    ~48 MiB on v7x (64 MiB per TC); conservative fallback if the query fails."""
    try:
        cap = int(pltpu.get_tpu_info().vmem_capacity_bytes)
    except Exception:
        cap = 64 << 20
    return max(16 << 20, min((cap * 3) // 4, 100 << 20))


def _token_tiling(M, target, sub):
    """Pick (tile_m, M_pad, n_m): tile_m a multiple of `sub`, minimal padding,
    and >=2 tiles when there is enough work (keeps both v7x TCs busy)."""
    M_sub = _round_up(M, sub)
    n_m = _cdiv(M_sub, target)
    if n_m == 1 and M_sub >= 512:
        n_m = 2
    tile_m = _round_up(_cdiv(M_sub, n_m), sub)
    return tile_m, tile_m * n_m, n_m


def _pick_tile_h(H, target):
    """Largest multiple-of-128 divisor of H that is <= target (else the
    smallest such divisor; else full H for small / odd hidden dims)."""
    divs = [d for d in range(128, H + 1, 128) if H % d == 0]
    if not divs:
        # TODO(synk): for very large H that is not a multiple of 128, pad H
        # instead of using a single full-H weight block.
        return H
    le = [d for d in divs if d <= target]
    return max(le) if le else min(divs)


def _resident_vmem(tile_m, C_in, H, C_out, x_it, w_it):
    weights = (C_in * H + H * C_out + H + C_out) * w_it
    io = tile_m * (C_in + C_out) * x_it
    hidden = tile_m * H * (4 + w_it)     # f32 activation temp + cast copy
    return 2 * weights + 2 * io + hidden


def _tiled_vmem(tile_m, tile_h, C_in, H, C_out, x_it, w_it):
    chunks = (C_in * tile_h + tile_h * C_out + tile_h + C_out) * w_it
    io = tile_m * (C_in + C_out) * x_it
    acc = tile_m * C_out * 4
    hidden = tile_m * tile_h * (4 + w_it)
    return 2 * chunks + 2 * io + acc + hidden


# ---------------------------------------------------------------------------
# Wrapper
# ---------------------------------------------------------------------------

@functools.partial(jax.jit, static_argnames=("tile_m", "tile_h", "force_tiled"))
def mlp_pallas(x, w1, b1, w2, b2, *, tile_m=512, tile_h=512, force_tiled=False):
    """x: [B, S, C_in]; w1: [C_in, H]; b1: [H]; w2: [H, C_out]; b2: [C_out]."""
    B, S, C_in = x.shape
    H = w1.shape[1]
    C_out = w2.shape[1]
    M = B * S

    x_it = jnp.dtype(x.dtype).itemsize
    w_it = jnp.dtype(w1.dtype).itemsize
    # Sublane packing granule for the activation dtype (f32:8, bf16:16, i8:32).
    sub = 8 if x_it >= 4 else (16 if x_it == 2 else 32)

    budget = _vmem_budget_bytes()

    # --- token tiling -------------------------------------------------------
    tm_target = max(sub, _round_up(min(tile_m, _round_up(M, sub)), sub))
    tile_m_eff, M_pad, n_m = _token_tiling(M, tm_target, sub)

    # --- choose path: weight residency when the VMEM budget allows ----------
    use_resident = (not force_tiled) and (
        _resident_vmem(tile_m_eff, C_in, H, C_out, x_it, w_it) <= budget)
    if (not use_resident) and (not force_tiled):
        # Shrink the token tile before giving up on resident weights.
        t = tm_target
        while t > 256:
            t = max(256, t // 2)
            tm2, mp2, nm2 = _token_tiling(M, t, sub)
            if _resident_vmem(tm2, C_in, H, C_out, x_it, w_it) <= budget:
                tile_m_eff, M_pad, n_m = tm2, mp2, nm2
                use_resident = True
                break

    th = None
    if not use_resident:
        th = _pick_tile_h(H, min(tile_h, 512))
        # Make sure the hidden-tiled working set fits the budget too.
        while (_tiled_vmem(tile_m_eff, th, C_in, H, C_out, x_it, w_it) > budget
               and tile_m_eff > 2 * sub):
            t = max(sub, _round_up(tile_m_eff // 2, sub))
            tile_m_eff, M_pad, n_m = _token_tiling(M, t, sub)

    # --- prepare operands ----------------------------------------------------
    x2d = x.reshape(M, C_in)
    if M_pad != M:
        x2d = jnp.pad(x2d, ((0, M_pad - M), (0, 0)))
    b1_2d = b1.reshape(1, H)
    b2_2d = b2.reshape(1, C_out)

    weight_bytes = (w1.size + w2.size + b1.size + b2.size) * w_it
    io_bytes = x2d.size * x_it + M_pad * C_out * x_it
    flops = 2 * M_pad * (C_in * H + H * C_out)
    transcendentals = M_pad * H

    if use_resident:
        # Weights streamed from HBM exactly once (constant index maps).
        cost = pl.CostEstimate(
            flops=flops,
            transcendentals=transcendentals,
            bytes_accessed=int(io_bytes + weight_bytes),
        )
        out = pl.pallas_call(
            mlp_resident_kernel,
            out_shape=jax.ShapeDtypeStruct((M_pad, C_out), x.dtype),
            grid_spec=pltpu.PrefetchScalarGridSpec(
                num_scalar_prefetch=0,
                grid=(n_m,),
                in_specs=[
                    pl.BlockSpec((tile_m_eff, C_in), lambda i: (i, 0)),  # x tile
                    pl.BlockSpec((C_in, H), lambda i: (0, 0)),           # w1 (resident)
                    pl.BlockSpec((1, H), lambda i: (0, 0)),              # b1
                    pl.BlockSpec((H, C_out), lambda i: (0, 0)),          # w2 (resident)
                    pl.BlockSpec((1, C_out), lambda i: (0, 0)),          # b2
                ],
                out_specs=pl.BlockSpec((tile_m_eff, C_out), lambda i: (i, 0)),
            ),
            compiler_params=pltpu.CompilerParams(
                dimension_semantics=("parallel",),
                vmem_limit_bytes=budget,
            ),
            cost_estimate=cost,
        )(x2d, w1, b1_2d, w2, b2_2d)
    else:
        n_h = H // th
        # Weights are re-streamed once per token tile in this fallback path.
        cost = pl.CostEstimate(
            flops=flops,
            transcendentals=transcendentals,
            bytes_accessed=int(io_bytes + n_m * weight_bytes),
        )
        out = pl.pallas_call(
            mlp_tiled_kernel,
            out_shape=jax.ShapeDtypeStruct((M_pad, C_out), x.dtype),
            grid_spec=pltpu.PrefetchScalarGridSpec(
                num_scalar_prefetch=0,
                grid=(n_m, n_h),
                in_specs=[
                    pl.BlockSpec((tile_m_eff, C_in), lambda i, h: (i, 0)),  # x tile
                    pl.BlockSpec((C_in, th), lambda i, h: (0, h)),          # w1 chunk
                    pl.BlockSpec((1, th), lambda i, h: (0, h)),             # b1 chunk
                    pl.BlockSpec((th, C_out), lambda i, h: (h, 0)),         # w2 chunk
                    pl.BlockSpec((1, C_out), lambda i, h: (0, 0)),          # b2
                ],
                out_specs=pl.BlockSpec((tile_m_eff, C_out), lambda i, h: (i, 0)),
                scratch_shapes=[pltpu.VMEM((tile_m_eff, C_out), jnp.float32)],
            ),
            compiler_params=pltpu.CompilerParams(
                dimension_semantics=("parallel", "arbitrary"),
                vmem_limit_bytes=budget,
            ),
            cost_estimate=cost,
        )(x2d, w1, b1_2d, w2, b2_2d)

    return out[:M].reshape(B, S, C_out)


# ---------------------------------------------------------------------------
# Reference + test harness
# ---------------------------------------------------------------------------

def reference_mlp(x, w1, b1, w2, b2):
    hp = jax.lax.Precision.HIGHEST
    h = jnp.einsum("bsc,ch->bsh", x.astype(jnp.float32), w1.astype(jnp.float32),
                   precision=hp) + b1.astype(jnp.float32)
    h = 0.5 * h * (1.0 + jax.lax.erf(h / jnp.sqrt(2.0)))
    y = jnp.einsum("bsh,ho->bso", h, w2.astype(jnp.float32),
                   precision=hp) + b2.astype(jnp.float32)
    return y.astype(x.dtype)


def _make_params(key, c_in, hidden, c_out, dtype):
    kw1, kb1, kw2, kb2 = jax.random.split(key, 4)
    bound1 = 1.0 / (c_in ** 0.5)
    w1 = jax.random.uniform(kw1, (c_in, hidden), minval=-bound1, maxval=bound1,
                            dtype=dtype)
    b1 = jax.random.uniform(kb1, (hidden,), minval=-bound1, maxval=bound1,
                            dtype=dtype)
    bound2 = 1.0 / (hidden ** 0.5)
    w2 = jax.random.uniform(kw2, (hidden, c_out), minval=-bound2, maxval=bound2,
                            dtype=dtype)
    b2 = jax.random.uniform(kb2, (c_out,), minval=-bound2, maxval=bound2,
                            dtype=dtype)
    return w1, b1, w2, b2


if __name__ == "__main__":
    key = jax.random.PRNGKey(0)

    # Case 1: toy config from the module (single grid step, resident weights).
    k1, k2, key = jax.random.split(key, 3)
    B, S, C_in, Hd, C_out = 2, 8, 32, 64, 32
    x = jax.random.normal(k1, (B, S, C_in), dtype=jnp.float32)
    w1, b1, w2, b2 = _make_params(k2, C_in, Hd, C_out, jnp.float32)
    y = jax.block_until_ready(mlp_pallas(x, w1, b1, w2, b2))
    y_ref = reference_mlp(x, w1, b1, w2, b2)
    assert y.shape == (B, S, C_out)
    assert jnp.allclose(y, y_ref, atol=1e-3, rtol=1e-3)

    # Case 2: forced hidden-tiled reduction path + multiple token tiles.
    k3, k4, key = jax.random.split(key, 3)
    B, S, C_in, Hd, C_out = 2, 200, 128, 512, 128
    x = jax.random.normal(k3, (B, S, C_in), dtype=jnp.float32)
    w1, b1, w2, b2 = _make_params(k4, C_in, Hd, C_out, jnp.float32)
    y = jax.block_until_ready(
        mlp_pallas(x, w1, b1, w2, b2, tile_m=256, tile_h=256, force_tiled=True))
    y_ref = reference_mlp(x, w1, b1, w2, b2)
    assert y.shape == (B, S, C_out)
    assert jnp.allclose(y, y_ref, atol=1e-3, rtol=1e-3)

    # Case 3: bf16 path (resident weights) + sublane-16 token padding
    #         (M = 198 -> padded to 208).
    k5, k6, key = jax.random.split(key, 3)
    B, S, C_in, Hd, C_out = 2, 99, 128, 256, 128
    x = jax.random.normal(k5, (B, S, C_in), dtype=jnp.bfloat16)
    w1, b1, w2, b2 = _make_params(k6, C_in, Hd, C_out, jnp.bfloat16)
    y = jax.block_until_ready(mlp_pallas(x, w1, b1, w2, b2))
    y_ref = reference_mlp(x, w1, b1, w2, b2)
    assert y.shape == (B, S, C_out)
    assert jnp.allclose(y.astype(jnp.float32), y_ref.astype(jnp.float32),
                        atol=3e-2, rtol=3e-2)

    print("KERNEL_OK")
</pallas_src>

<mosaic_0001>
module attributes {stable_mosaic.version = 11 : i64} {
  func.func @mlp_resident_kernel(%arg0: i32, %arg1: memref<16x32xf32, #tpu.memory_space<vmem>>, %arg2: memref<32x64xf32, #tpu.memory_space<vmem>>, %arg3: memref<1x64xf32, #tpu.memory_space<vmem>>, %arg4: memref<64x32xf32, #tpu.memory_space<vmem>>, %arg5: memref<1x32xf32, #tpu.memory_space<vmem>>, %arg6: memref<16x32xf32, #tpu.memory_space<vmem>>) attributes {dimension_semantics = [#tpu.dimension_semantics<parallel>], iteration_bounds = array<i64: 1>, scalar_prefetch = 0 : i64, scratch_operands = 0 : i64, tpu.core_type = #tpu.core_type<tc>, window_params = [{transform_indices = @transform_0, window_bounds = array<i64: 16, 32>}, {pipeline_mode = #tpu.pipeline_mode<synchronous>, transform_indices = @transform_1, window_bounds = array<i64: 32, 64>}, {pipeline_mode = #tpu.pipeline_mode<synchronous>, transform_indices = @transform_2, window_bounds = array<i64: 1, 64>}, {pipeline_mode = #tpu.pipeline_mode<synchronous>, transform_indices = @transform_3, window_bounds = array<i64: 64, 32>}, {pipeline_mode = #tpu.pipeline_mode<synchronous>, transform_indices = @transform_4, window_bounds = array<i64: 1, 32>}, {transform_indices = @transform_5, window_bounds = array<i64: 16, 32>}]} {
    %c0 = arith.constant 0 : index
    %c0_0 = arith.constant 0 : index
    %0 = vector.load %arg1[%c0, %c0_0] : memref<16x32xf32, #tpu.memory_space<vmem>>, vector<16x32xf32>
    %c0_1 = arith.constant 0 : index
    %c0_2 = arith.constant 0 : index
    %1 = vector.load %arg2[%c0_1, %c0_2] : memref<32x64xf32, #tpu.memory_space<vmem>>, vector<32x64xf32>
    %cst = arith.constant dense<0.000000e+00> : vector<16x64xf32>
    %2 = tpu.matmul %0, %1, %cst {dimension_numbers = #tpu.dot_dimension_numbers<[1], [0], [0], [1], [0, 0, 1, 1], [], []>} : vector<16x32xf32>, vector<32x64xf32>, vector<16x64xf32> -> vector<16x64xf32>
    %c0_3 = arith.constant 0 : index
    %c0_4 = arith.constant 0 : index
    %3 = vector.load %arg3[%c0_3, %c0_4] : memref<1x64xf32, #tpu.memory_space<vmem>>, vector<1x64xf32>
    %4 = vector.broadcast %3 : vector<1x64xf32> to vector<16x64xf32>
    %5 = arith.addf %2, %4 : vector<16x64xf32>
    %cst_5 = arith.constant 5.000000e-01 : f32
    %6 = vector.broadcast %cst_5 : f32 to vector<16x64xf32>
    %7 = arith.mulf %6, %5 : vector<16x64xf32>
    %cst_6 = arith.constant 0.707106769 : f32
    %8 = vector.broadcast %cst_6 : f32 to vector<16x64xf32>
    %9 = arith.mulf %5, %8 : vector<16x64xf32>
    %10 = math.erf %9 : vector<16x64xf32>
    %cst_7 = arith.constant 1.000000e+00 : f32
    %11 = vector.broadcast %cst_7 : f32 to vector<16x64xf32>
    %12 = arith.addf %11, %10 : vector<16x64xf32>
    %13 = arith.mulf %7, %12 : vector<16x64xf32>
    %c0_8 = arith.constant 0 : index
    %c0_9 = arith.constant 0 : index
    %14 = vector.load %arg4[%c0_8, %c0_9] : memref<64x32xf32, #tpu.memory_space<vmem>>, vector<64x32xf32>
    %cst_10 = arith.constant dense<0.000000e+00> : vector<16x32xf32>
    %15 = tpu.matmul %13, %14, %cst_10 {dimension_numbers = #tpu.dot_dimension_numbers<[1], [0], [0], [1], [0, 0, 1, 1], [], []>} : vector<16x64xf32>, vector<64x32xf32>, vector<16x32xf32> -> vector<16x32xf32>
    %c0_11 = arith.constant 0 : index
    %c0_12 = arith.constant 0 : index
    %16 = vector.load %arg5[%c0_11, %c0_12] : memref<1x32xf32, #tpu.memory_space<vmem>>, vector<1x32xf32>
    %17 = vector.broadcast %16 : vector<1x32xf32> to vector<16x32xf32>
    %18 = arith.addf %15, %17 : vector<16x32xf32>
    %c0_13 = arith.constant 0 : index
    %c0_14 = arith.constant 0 : index
    %19 = vector.load %arg6[%c0_13, %c0_14] : memref<16x32xf32, #tpu.memory_space<vmem>>, vector<16x32xf32>
    tpu.vector_store %arg6[%c0_13, %c0_14], %18 {strides = array<i32>} : memref<16x32xf32, #tpu.memory_space<vmem>>, vector<16x32xf32>,
    return
  }
  func.func @transform_0(%arg0: i32) -> (i32, i32) {
    %c0_i32 = arith.constant 0 : i32
    %c0_i32_0 = arith.constant 0 : i32
    return %arg0, %c0_i32 : i32, i32
  }
  func.func @transform_1(%arg0: i32) -> (i32, i32) {
    %c0_i32 = arith.constant 0 : i32
    %c0_i32_0 = arith.constant 0 : i32
    %c0_i32_1 = arith.constant 0 : i32
    return %c0_i32, %c0_i32_0 : i32, i32
  }
  func.func @transform_2(%arg0: i32) -> (i32, i32) {
    %c0_i32 = arith.constant 0 : i32
    %c0_i32_0 = arith.constant 0 : i32
    %c0_i32_1 = arith.constant 0 : i32
    return %c0_i32, %c0_i32_0 : i32, i32
  }
  func.func @transform_3(%arg0: i32) -> (i32, i32) {
    %c0_i32 = arith.constant 0 : i32
    %c0_i32_0 = arith.constant 0 : i32
    %c0_i32_1 = arith.constant 0 : i32
    return %c0_i32, %c0_i32_0 : i32, i32
  }
  func.func @transform_4(%arg0: i32) -> (i32, i32) {
    %c0_i32 = arith.constant 0 : i32
    %c0_i32_0 = arith.constant 0 : i32
    %c0_i32_1 = arith.constant 0 : i32
    return %c0_i32, %c0_i32_0 : i32, i32
  }
  func.func @transform_5(%arg0: i32) -> (i32, i32) {
    %c0_i32 = arith.constant 0 : i32
    %c0_i32_0 = arith.constant 0 : i32
    return %arg0, %c0_i32 : i32, i32
  }
}

</mosaic_0001>

<bundles_post_ra>
// kernel: mlp_pallas.1
= control target key start
LH: loop header
LB: loop body
LE: loop exit
PB: predicated region body
PF: predicated region fallthrough
CT: control target
= control target key end

     0   :  { %vm34_vm0 = vcmask 261120   ;;  %s410_s0 = inlined_call_operand.vmem [shape: f32[16,32], index: 0, kind: input, shape index: {}]   ;;  %s411_s1 = inlined_call_operand.vmem [shape: f32[32,64], index: 1, kind: input, shape index: {}]   ;;  %s412_s2 = inlined_call_operand.vmem [shape: f32[1,64], index: 2, kind: input, shape index: {}]   ;;  %s413_s3 = inlined_call_operand.vmem [shape: f32[64,32], index: 3, kind: input, shape index: {}]   ;;  %s414_s4 = inlined_call_operand.vmem [shape: f32[1,32], index: 4, kind: input, shape index: {}]   ;;  %s415_s5 = inlined_call_operand.hbm [shape: f32[16,32], index: 5, kind: output, shape index: {}]  }
   0x1   :  { %v26_v0 = vld [vmem:[%s411_s1 + $0x18] sm:$0xff]  ;;  %v25_v1 = vld [vmem:[%s411_s1 + $0x10] sm:$0xff]  ;;  %v21_v2 = vld [vmem:[%s410_s0] sm:$0xff] }
   0x2   :  { %263 = vmatprep.subr.mxu0 %v26_v0  ;;  %v24_v3 = vld [vmem:[%s411_s1 + $0x8] sm:$0xff]  ;;  %271 = vmatprep.mubr.msk.f32.mxu0 %vm34_vm0, %v21_v2 }
   0x3   :  { %264 = vmatpush3.msra.mxu0 %v26_v0 }
   0x4   :  { %10 = vsyncpa [#allocation3], 0  ;;  %265 = vmatprep.subr.mxu0 %v25_v1  ;;  %v23_v4 = vld [vmem:[%s411_s1] sm:$0xff]  ;;  %v22_v5 = vld [vmem:[%s410_s0 + $0x8] sm:$0xff]  ;;  %vm141_vm1 = vcmask 523264   ;;  %s322_s21 = smov [#allocation2]  }
   0x5   :  { %266 = vmatpush3.msra.mxu0 %v25_v1  ;;  %v133_v6 = vld [vmem:[%s413_s3 + $0x38] sm:$0xff]  ;;  %v132_v7 = vld [vmem:[%s413_s3 + $0x30] sm:$0xff]  ;;  %v131_v8 = vld [vmem:[%s413_s3 + $0x28] sm:$0xff]  ;;  %s230_s22 = sshll.u32 %s322_s21, 4  ;;  %s231_s22 = int_to_ptr.vmem [resolvable:$true] %s230_s22 }
   0x6   :  { %267 = vmatprep.subr.mxu0 %v24_v3  ;;  %274 = vmatprep.subr.mxu1 %v133_v6  ;;  %v130_v9 = vld [vmem:[%s413_s3 + $0x20] sm:$0xff]  ;;  %v129_v10 = vld [vmem:[%s413_s3 + $0x18] sm:$0xff]  ;;  %v128_v11 = vld [vmem:[%s413_s3 + $0x10] sm:$0xff]  ;;  %s300_s23 = scalar_lea.vmem %s231_s22, 256  ;;  %p305_p1 = scmp.lt.s32.totalorder %s231_s22, %s231_s22 }
   0x7   :  { %268 = vmatpush3.msra.mxu0 %v24_v3  ;;  %275 = vmatpush3.msra.mxu1 %v133_v6  ;;  %v127_v12 = vld [vmem:[%s413_s3 + $0x8] sm:$0xff]  ;;  %v126_v13 = vld [vmem:[%s413_s3] sm:$0xff]  ;;  %p301_p0 = scmp.ne.s32.totalorder %s231_s22, %s300_s23  ;;  %p306_p2 = scmp.lt.s32.totalorder %s300_s23, %s300_s23 }
   0x8   :  { %269 = vmatprep.subr.mxu0 %v23_v4  ;;  %276 = vmatprep.subr.mxu1 %v132_v7  ;;  %v241_v14 = vld [vmem:[%s412_s2] ss:$0 sm:$0xff] }
   0x9   :  { %270 = vmatpush3.msra.mxu0 %v23_v4  ;;  %277 = vmatpush3.msra.mxu1 %v132_v7  ;;  %v244_v29 = vld [vmem:[%s414_s4] ss:$0 sm:$0xff]  ;;  %p307_p3 = por %p306_p2, %p305_p1 }
   0xa   :  { %272 = vmatmul.mubr.msk.f32.vlgmr.msra.gmra.mxu0 %vm34_vm0, %v22_v5  ;;  %278 = vmatprep.subr.mxu1 %v131_v8 }
   0xb   :  { %279 = vmatpush3.msra.mxu1 %v131_v8  ;;  %p308_p4 = pnand %p307_p3, %p301_p0 }
   0xc   :  { %280 = vmatprep.subr.mxu1 %v130_v9 }
   0xd   :  { %281 = vmatpush3.msra.mxu1 %v130_v9 }
   0xe   :  { %282 = vmatprep.subr.mxu1 %v129_v10 }
   0xf   :  { %283 = vmatpush3.msra.mxu1 %v129_v10 }
  0x10   :  { %284 = vmatprep.subr.mxu1 %v128_v11 }
  0x11   :  { %285 = vmatpush3.msra.mxu1 %v128_v11 }
  0x12   :  { %286 = vmatprep.subr.mxu1 %v127_v12 }
  0x13   :  { %287 = vmatpush3.msra.mxu1 %v127_v12 }
  0x14   :  { %288 = vmatprep.subr.mxu1 %v126_v13 }
  0x15   :  { %289 = vmatpush3.msra.mxu1 %v126_v13 }
  0xca   :  { %v273_v15 = vpop.f32.mrf.mxu0 }
  0xcb   :  { %v113_v16 = vadd.f32 %v273_v15, %v241_v14 }
  0xcc   :  { %v107_v17 = vpop.f32.mrf.mxu0 }
  0xcd   :  { %v119_v18 = vmul.f32 0.70710677, %v113_v16  ;;  %v108_v19 = vadd.f32 %v241_v14, %v107_v17  ;;  %v117_v26 = vmul.f32 0.5, %v113_v16 }
  0xcf   :  { %296 = verf.f32 %v119_v18  ;;  %v118_v20 = vmul.f32 0.70710677, %v108_v19  ;;  %v116_v24 = vmul.f32 0.5, %v108_v19 }
  0xd1   :  { %298 = verf.f32 %v118_v20 }
  0xdc   :  { %v297_v21 = vpop.eup %296 }
  0xdd   :  { %v123_v23 = vadd.f32 1.0, %v297_v21 }
  0xde   :  { %v299_v22 = vpop.eup %298 }
  0xdf   :  { %v122_v25 = vadd.f32 1.0, %v299_v22  ;;  %v125_v28 = vmul.f32 %v123_v23, %v117_v26 }
  0xe1   :  { %v124_v27 = vmul.f32 %v122_v25, %v116_v24 }
  0xe3   :  { %290 = vmatprep.mubr.msk.f32.mxu1 %vm141_vm1, %v124_v27 }
  0xe4   :  { %291 = vmatmul.mubr.msk.f32.vlgmr.msra.gmra.mxu1 %vm141_vm1, %v125_v28 }
 0x1a4   :  { %v292_v30 = vpop.f32.mrf.mxu1 }
 0x1a5   :  { %v220_v31 = vadd.f32 %v292_v30, %v244_v29 }
 0x1a6   :  { %v214_v32 = vpop.f32.mrf.mxu1 }
 0x1a7   :  { %224 = vst.msk [vmem:[#allocation2 + $0x8] sm:$0xff] %vm34_vm0, %v220_v31  ;;  %v215_v33 = vadd.f32 %v244_v29, %v214_v32 }
 0x1a9   :  { %223 = vst.msk [vmem:[#allocation2] sm:$0xff] %vm34_vm0, %v215_v33 }
 0x1aa   :  { %311 = shalt.err (!%p308_p4)
}
 0x1ab   :  { %s323_s24 = smov 128   ;;  %s324_s4 = smov 8  }
 0x1ac   :  { %236 = dma.vmem_to_hbm [thread:$0]  %s231_s22, 256, %s415_s5, [#allocation3], %s323_s24, %s323_s24, %s324_s4  }
 0x1ad   :  { %320 = dma.done.wait [#allocation3], 256  }
 0x1ae   :  { %321 = vsyncadd [#allocation3], 4294967040 }
 0x1af   :  { %240 = vsyncpa [#allocation3], 1 }

</bundles_post_ra>
